<compile_context>
chip_gen: v6e
topology: v6e:2x2x1
jax: 0.10.0
libtpu: 0.0.40
codegen_flags: <defaults>
</compile_context>

<pallas_src>
import jax
import jax.numpy as jnp
from jax.experimental import pallas as pl
from jax.experimental.pallas import tpu as pltpu


def _round_up(v, m):
    return -(-v // m) * m


def _sag_kernel(x_ref, w1_ref, b1_ref, w2_ref, b2_ref, o_ref):
    # x_ref : (NB, C, TS)  channels on sublanes, spatial pixels on lanes
    # w1_ref: (R, C)  fc1 weight
    # b1_ref: (R, 1)  fc1 bias (column -> broadcasts over lanes)
    # w2_ref: (R, 1)  fc2 weight (column)
    # b2_ref: (1, 1)  fc2 bias, SMEM scalar
    # o_ref : (NB, 1, TS) lane-dense output
    w1 = w1_ref[...]
    b1 = b1_ref[...]
    w2 = w2_ref[...]
    b2 = b2_ref[0, 0]
    nb = x_ref.shape[0]

    for n in range(nb):  # static unroll over the (small) batch block
        x = x_ref[n]                                           # (C, TS)
        # fc1: contract the (tiny) channel axis on the MXU — keeps the VALU
        # free; VPU is then only bias/ReLU/fc2, flipping the kernel to the
        # memory-bound regime.
        h = jax.lax.dot_general(
            w1, x, (((1,), (0,)), ((), ())),
            preferred_element_type=jnp.float32)                # (R, TS)
        h = jnp.maximum(h + b1, 0.0)                           # bias + ReLU
        # fc2 (R -> 1): VPU multiply + sublane (XLU) reduction + scalar bias.
        y = jnp.sum(h * w2, axis=0, keepdims=True) + b2        # (1, TS)
        o_ref[n] = jax.nn.sigmoid(y).astype(o_ref.dtype)


def spatial_attention_gate(x_nchw, w1, b1, w2, b2, *,
                           target_pixels=65536,
                           vmem_budget_bytes=12 << 20):
    """x_nchw: (N, C, H, W) float32.
    w1: (R, C) fc1 weight (PyTorch 1x1 conv weight squeezed), b1: (R,)
    w2: (1, R) fc2 weight, b2: (1,)
    Returns (N, 1, H, W)."""
    N, C, H, W = x_nchw.shape
    R = w1.shape[0]
    S = H * W

    # NCHW -> (N, C, S): free contiguous reshape. No padding, no extra HBM pass.
    x3d = jnp.asarray(x_nchw, jnp.float32).reshape(N, C, S)

    # ---- tile selection --------------------------------------------------
    if S >= target_pixels:
        # Large images: tile the spatial axis, one batch entry per step.
        nb = 1
        ts = max(128, (target_pixels // 128) * 128)
        # v7x megacore: keep >= 4 parallel grid steps when N is small so both
        # TensorCores get work.
        min_steps = 4
        if N * pl.cdiv(S, ts) < min_steps:
            steps_s = pl.cdiv(min_steps, N)
            ts = min(ts, max(128, _round_up(pl.cdiv(S, steps_s), 128)))
    else:
        # Small/medium images: full spatial extent per step (block dim equal
        # to the full array dim satisfies the (8,128) rule for any S); pack
        # several batch entries per step to amortize step overhead.
        ts = S
        nb = max(1, min(N, 16, target_pixels // S))
        if nb >= N and N > 1:
            nb = max(1, N // 2)  # keep >= 2 parallel grid steps (v7x)

    # VMEM-aware clamp: double-buffered x/out blocks + (R, ts) hidden + slack.
    # Keeps the kernel inside every generation's scoped-VMEM default, also for
    # large channel counts when this wrapper is reused.
    per_pixel_bytes = 4 * (2 * (C + 1) + R + 4)
    if nb * ts * per_pixel_bytes > vmem_budget_bytes:
        if nb > 1:
            nb = max(1, vmem_budget_bytes // (ts * per_pixel_bytes))
        if nb * ts * per_pixel_bytes > vmem_budget_bytes and ts > 128:
            ts = max(128, ((vmem_budget_bytes // (nb * per_pixel_bytes)) // 128) * 128)

    grid = (pl.cdiv(N, nb), pl.cdiv(S, ts))

    w1_a = jnp.asarray(w1, jnp.float32)                    # (R, C)
    b1_c = jnp.asarray(b1, jnp.float32).reshape(R, 1)      # (R, 1)
    w2_c = jnp.asarray(w2, jnp.float32).reshape(R, 1)      # (R, 1)
    b2_c = jnp.asarray(b2, jnp.float32).reshape(1, 1)      # (1, 1) -> SMEM

    cost = pl.CostEstimate(
        flops=2 * N * S * R * (C + 1),
        transcendentals=N * S,
        bytes_accessed=4 * N * S * (C + 1),
    )

    out3d = pl.pallas_call(
        _sag_kernel,
        out_shape=jax.ShapeDtypeStruct((N, 1, S), jnp.float32),
        grid_spec=pltpu.PrefetchScalarGridSpec(
            num_scalar_prefetch=0,
            grid=grid,
            in_specs=[
                pl.BlockSpec((nb, C, ts), lambda n, s: (n, 0, s)),  # x tile
                pl.BlockSpec((R, C), lambda n, s: (0, 0)),          # w1
                pl.BlockSpec((R, 1), lambda n, s: (0, 0)),          # b1
                pl.BlockSpec((R, 1), lambda n, s: (0, 0)),          # w2
                pl.BlockSpec(memory_space=pltpu.SMEM),              # b2 scalar
            ],
            out_specs=pl.BlockSpec((nb, 1, ts), lambda n, s: (n, 0, s)),
        ),
        compiler_params=pltpu.CompilerParams(
            dimension_semantics=("parallel", "parallel"),
        ),
        cost_estimate=cost,
    )(x3d, w1_a, b1_c, w2_c, b2_c)

    # (N, 1, S) -> (N, 1, H, W): free reshape.
    return out3d.reshape(N, 1, H, W)


def _reference(x_nchw, w1, b1, w2, b2):
    # Pure-JAX reference of the PyTorch forward (1x1 convs as einsums).
    h = jnp.einsum("nchw,rc->nrhw", x_nchw, w1,
                   precision=jax.lax.Precision.HIGHEST) + b1[None, :, None, None]
    h = jnp.maximum(h, 0.0)
    y = jnp.einsum("nrhw,or->nohw", h, w2,
                   precision=jax.lax.Precision.HIGHEST) + b2[None, :, None, None]
    return jax.nn.sigmoid(y)


if __name__ == "__main__":
    # Shapes implied by the module: NCHW input, channel=4, reduction=16.
    N, C, H, W = 2, 4, 16, 16
    R = 16

    key = jax.random.PRNGKey(0)
    kx, k1, k2, k3, k4 = jax.random.split(key, 5)

    x = jax.random.normal(kx, (N, C, H, W), dtype=jnp.float32)
    # Parameter shapes match nn.Conv2d(C,R,1) / nn.Conv2d(R,1,1) weights with
    # the trailing 1x1 kernel dims squeezed.
    w1 = jax.random.normal(k1, (R, C), dtype=jnp.float32) * 0.1
    b1 = jax.random.normal(k2, (R,), dtype=jnp.float32) * 0.1
    w2 = jax.random.normal(k3, (1, R), dtype=jnp.float32) * 0.1
    b2 = jax.random.normal(k4, (1,), dtype=jnp.float32) * 0.1

    out = spatial_attention_gate(x, w1, b1, w2, b2)
    out = jax.block_until_ready(out)

    ref = _reference(x, w1, b1, w2, b2)
    assert out.shape == (N, 1, H, W)
    # fc1 now runs on the MXU; f32 matmul passes may reorder/round accumulation
    # slightly, so compare with a modest tolerance.
    assert jnp.allclose(out, ref, atol=2e-3, rtol=2e-3), "mismatch vs reference"

    print("KERNEL_OK")
</pallas_src>

<mosaic_0001>
module attributes {stable_mosaic.version = 11 : i64} {
  func.func @_sag_kernel(%arg0: i32, %arg1: i32, %arg2: memref<1x4x256xf32, #tpu.memory_space<vmem>>, %arg3: memref<16x4xf32, #tpu.memory_space<vmem>>, %arg4: memref<16x1xf32, #tpu.memory_space<vmem>>, %arg5: memref<16x1xf32, #tpu.memory_space<vmem>>, %arg6: memref<1x1xf32, #tpu.memory_space<smem>>, %arg7: memref<1x1x256xf32, #tpu.memory_space<vmem>>) attributes {dimension_semantics = [#tpu.dimension_semantics<parallel>, #tpu.dimension_semantics<parallel>], iteration_bounds = array<i64: 2, 1>, scalar_prefetch = 0 : i64, scratch_operands = 0 : i64, tpu.core_type = #tpu.core_type<tc>, window_params = [{transform_indices = @transform_0, window_bounds = array<i64: 1, 4, 256>}, {pipeline_mode = #tpu.pipeline_mode<synchronous>, transform_indices = @transform_1, window_bounds = array<i64: 16, 4>}, {pipeline_mode = #tpu.pipeline_mode<synchronous>, transform_indices = @transform_2, window_bounds = array<i64: 16, 1>}, {pipeline_mode = #tpu.pipeline_mode<synchronous>, transform_indices = @transform_3, window_bounds = array<i64: 16, 1>}, {transform_indices = @transform_4, window_bounds = array<i64: 1, 1>}, {transform_indices = @transform_5, window_bounds = array<i64: 1, 1, 256>}]} {
    %c0 = arith.constant 0 : index
    %c0_0 = arith.constant 0 : index
    %0 = vector.load %arg3[%c0, %c0_0] : memref<16x4xf32, #tpu.memory_space<vmem>>, vector<16x4xf32>
    %c0_1 = arith.constant 0 : index
    %c0_2 = arith.constant 0 : index
    %1 = vector.load %arg4[%c0_1, %c0_2] : memref<16x1xf32, #tpu.memory_space<vmem>>, vector<16x1xf32>
    %c0_3 = arith.constant 0 : index
    %c0_4 = arith.constant 0 : index
    %2 = vector.load %arg5[%c0_3, %c0_4] : memref<16x1xf32, #tpu.memory_space<vmem>>, vector<16x1xf32>
    %c0_5 = arith.constant 0 : index
    %c0_6 = arith.constant 0 : index
    %3 = memref.load %arg6[%c0_5, %c0_6] : memref<1x1xf32, #tpu.memory_space<smem>>
    %c0_7 = arith.constant 0 : index
    %c0_8 = arith.constant 0 : index
    %c0_9 = arith.constant 0 : index
    %4 = vector.load %arg2[%c0_7, %c0_8, %c0_9] : memref<1x4x256xf32, #tpu.memory_space<vmem>>, vector<1x4x256xf32>
    %5 = vector.shape_cast %4 : vector<1x4x256xf32> to vector<4x256xf32>
    %cst = arith.constant dense<0.000000e+00> : vector<16x256xf32>
    %6 = tpu.matmul %0, %5, %cst {dimension_numbers = #tpu.dot_dimension_numbers<[1], [0], [0], [1], [0, 0, 1, 1], [], []>} : vector<16x4xf32>, vector<4x256xf32>, vector<16x256xf32> -> vector<16x256xf32>
    %7 = vector.broadcast %1 : vector<16x1xf32> to vector<16x256xf32>
    %8 = arith.addf %6, %7 : vector<16x256xf32>
    %cst_10 = arith.constant 0.000000e+00 : f32
    %9 = vector.broadcast %cst_10 : f32 to vector<16x256xf32>
    %10 = arith.maximumf %8, %9 : vector<16x256xf32>
    %11 = vector.broadcast %2 : vector<16x1xf32> to vector<16x256xf32>
    %12 = arith.mulf %10, %11 : vector<16x256xf32>
    %cst_11 = arith.constant dense<0.000000e+00> : vector<256xf32>
    %13 = vector.multi_reduction <add>, %12, %cst_11 [0] : vector<16x256xf32> to vector<256xf32>
    %14 = vector.shape_cast %13 : vector<256xf32> to vector<1x256xf32>
    %15 = vector.broadcast %3 : f32 to vector<1x256xf32>
    %16 = arith.addf %14, %15 : vector<1x256xf32>
    %17 = arith.negf %16 : vector<1x256xf32>
    %18 = math.exp %17 : vector<1x256xf32>
    %cst_12 = arith.constant 1.000000e+00 : f32
    %19 = vector.broadcast %cst_12 : f32 to vector<1x256xf32>
    %20 = arith.addf %19, %18 : vector<1x256xf32>
    %21 = arith.divf %19, %20 : vector<1x256xf32>
    %c0_13 = arith.constant 0 : index
    %c0_14 = arith.constant 0 : index
    %c0_15 = arith.constant 0 : index
    %22 = vector.load %arg7[%c0_13, %c0_14, %c0_15] : memref<1x1x256xf32, #tpu.memory_space<vmem>>, vector<1x1x256xf32>
    %23 = vector.shape_cast %22 : vector<1x1x256xf32> to vector<1x256xf32>
    %24 = vector.shape_cast %21 : vector<1x256xf32> to vector<1x1x256xf32>
    tpu.vector_store %arg7[%c0_13, %c0_14, %c0_15], %24 {strides = array<i32>} : memref<1x1x256xf32, #tpu.memory_space<vmem>>, vector<1x1x256xf32>,
    return
  }
  func.func @transform_0(%arg0: i32, %arg1: i32) -> (i32, i32, i32) {
    %c0_i32 = arith.constant 0 : i32
    %c0_i32_0 = arith.constant 0 : i32
    return %arg0, %c0_i32, %arg1 : i32, i32, i32
  }
  func.func @transform_1(%arg0: i32, %arg1: i32) -> (i32, i32) {
    %c0_i32 = arith.constant 0 : i32
    %c0_i32_0 = arith.constant 0 : i32
    %c0_i32_1 = arith.constant 0 : i32
    return %c0_i32, %c0_i32_0 : i32, i32
  }
  func.func @transform_2(%arg0: i32, %arg1: i32) -> (i32, i32) {
    %c0_i32 = arith.constant 0 : i32
    %c0_i32_0 = arith.constant 0 : i32
    %c0_i32_1 = arith.constant 0 : i32
    return %c0_i32, %c0_i32_0 : i32, i32
  }
  func.func @transform_3(%arg0: i32, %arg1: i32) -> (i32, i32) {
    %c0_i32 = arith.constant 0 : i32
    %c0_i32_0 = arith.constant 0 : i32
    %c0_i32_1 = arith.constant 0 : i32
    return %c0_i32, %c0_i32_0 : i32, i32
  }
  func.func @transform_4(%arg0: i32, %arg1: i32) -> (i32, i32) {
    %c0_i32 = arith.constant 0 : i32
    %c0_i32_0 = arith.constant 0 : i32
    %c0_i32_1 = arith.constant 0 : i32
    return %c0_i32, %c0_i32_0 : i32, i32
  }
  func.func @transform_5(%arg0: i32, %arg1: i32) -> (i32, i32, i32) {
    %c0_i32 = arith.constant 0 : i32
    %c0_i32_0 = arith.constant 0 : i32
    return %arg0, %c0_i32, %arg1 : i32, i32, i32
  }
}

</mosaic_0001>

<bundles_post_ra>
// kernel: tpu_custom_call.1
= control target key start
LH: loop header
LB: loop body
LE: loop exit
PB: predicated region body
PF: predicated region fallthrough
CT: control target
= control target key end

     0   :  { %s851_s0 = inlined_call_operand.vmem [shape: f32[2,4,256], index: 0, kind: input, shape index: {}]   ;;  %s852_s1 = inlined_call_operand.vmem [shape: f32[16,4], index: 1, kind: input, shape index: {}]   ;;  %s853_s2 = inlined_call_operand.vmem [shape: f32[16,1], index: 2, kind: input, shape index: {}]   ;;  %s854_s3 = inlined_call_operand.vmem [shape: f32[16,1], index: 3, kind: input, shape index: {}]   ;;  %s855_s4 = inlined_call_operand.<no memory space> [shape: f32[1,1], index: 4, kind: input, shape index: {}]   ;;  %s856_s5 = inlined_call_operand.hbm [shape: f32[2,1,256], index: 5, kind: output, shape index: {}]  }
   0x1   :  { %10 = sst [smem:[#allocation2]] %s855_s4 }
   0x2   :  { %11 = vsyncpa [#allocation4], 0 }
   0x3   :  { %13 = vsyncpa [#allocation4 + $0x1], 0  ;;  %s734_s20 = smov 0   ;;  %s736_s21 = smov 0  }
   0x4   :  { %s738_s22 = smov 0   ;;  %s740_s23 = smov 0  }
   0x5   :  { %s742_s24 = smov 0   ;;  %s744_s25 = smov 0  }
   0x6 LB: > { %s527_s4 = sadd.s32 4294967295, %s695_s25   ;;  %s528_s26 = sadd.s32 4294967294, %s695_s25   ;;  %s695_s25 = sphi %s744_s25, %s19_s25   ;;  %s691_s24 = sphi %s742_s24, %s863_s24   ;;  %s687_s23 = sphi %s740_s23, %s862_s23   ;;  %s683_s22 = sphi %s738_s22, %s861_s22   ;;  %s679_s21 = sphi %s736_s21, %s860_s21   ;;  %s675_s20 = sphi %s734_s20, %s859_s20  }
   0x7   : > { %s31_s27 = sadd.s32 1, %s691_s24  ;;  %s152_s28 = sadd.s32 1, %s683_s22 }
   0x8   : > { %p33_p0 = scmp.ge.s32.totalorder %s31_s27, 2  ;;  %p162_p1 = scmp.ne.s32.totalorder %s683_s22, %s679_s21 }
   0x9   : > { %p163_p2 = scmp.eq.s32.totalorder %s527_s4, 1  ;;  %p168_p3 = scmp.ne.s32.totalorder %s679_s21, %s675_s20 }
   0xa   : > { %s865_s27 = smov (%p33_p0, %s31_s27), 0  ;;  %p169_p5 = scmp.eq.s32.totalorder %s528_s26, 1 }
   0xb   : > { %p774_p4 = por %p163_p2, %p162_p1  ;;  %s147_s30 = ssub.s32 %s691_s24, %s865_s27 }
   0xc   : > { %p531_p6 = scmp.ge.s32.totalorder %s695_s25, 1  ;;  %p150_p7 = scmp.eq.s32.totalorder %s147_s30, 0 }
   0xd   : > { %p781_p8 = por %p169_p5, %p168_p3  ;;  %p212_p9 = scmp.lt.s32.totalorder %s695_s25, 3 }
   0xe   : > { %s787_s7 = scalar_select %p150_p7, %s683_s22, %s152_s28  }
   0xf   : > { %p213_p10 = pnand %p531_p6, %p212_p9 }
  0x10   : > { %p245_p11 = scmp.lt.s32.totalorder (!%p213_p10), %s687_s23, 1  ;;  %s261_s9 = sld [smem:[#allocation2]] (!%p213_p10) }
  0x11   : > { %216 = sbr.rel (%p213_p10) target bundleno = 300 (0x12c), region = 40  ;;  %s241_s10 = sand.u32 (!%p213_p10), 1, %s679_s21  }
  0x12   : > { %s532_s11 = sshll.u32 (!%p213_p10), %s241_s10, 1  ;;  %s435_s18 = scalar_lea.sflag (!%p213_p10), [#allocation4], %s241_s10 }
  0x16   : > { %v697_v0 = vmov 0.0   ;;  %v257_v1 = vld [vmem:[%s853_s2] sm:$0xff]  ;;  %s246_s12 = scalar_select %p245_p11, %s687_s23, 1  ;;  %v698_v3 = vmov 0   ;;  %v258_v4 = vld [vmem:[%s853_s2 + $0x8] sm:$0xff]  ;;  %vm282_vm0 = vcmask 1043456   ;;  %v396_v41 = vstv %s261_s9 }
  0x17   : > { %351 = vmatprep.mubr.f32.mxu0 %v697_v0  ;;  %357 = vmatprep.mubr.f32.mxu1 %v697_v0  ;;  %v259_v2 = vld [vmem:[%s854_s3] sm:$0xff]  ;;  %v260_v5 = vld [vmem:[%s854_s3 + $0x8] sm:$0xff]  ;;  %vm275_vm1 = vcmask 31744   ;;  %v699_v53 = vmov 1966171168   ;;  %v417_v55 = vlaneseq }
  0x18   : > { %608 = vset.pattern.permute.xlu0 %v698_v3  ;;  %609 = vset.pattern.permute.xlu1 %v698_v3  ;;  %s546_s13 = sshll.u32 %s246_s12, 3  ;;  %v255_v8 = vld [vmem:[%s852_s1] sm:$0xff]  ;;  %v256_v9 = vld [vmem:[%s852_s1 + $0x8] sm:$0xff]  ;;  %v415_v54 = vunpack.c.l.s4 %v699_v53  ;;  %s547_s12 = sshll.u32 %s687_s23, 5 }
  0x19   : > { %265 = vperm.xlu0 %608, %v257_v1   ;;  %370 = vperm.xlu1 %609, %v259_v2   ;;  %s252_s4 = scalar_lea.vmem %s851_s0, %s546_s13  ;;  %v418_v57 = vshrl.u32 %v417_v55, 7  ;;  %s243_s13 = scalar_lea.vmem [#allocation3], %s532_s11  ;;  %vm431_vm2 = vcmp.lt.s32.totalorder %v417_v55, 256 }
  0x1a   : > { %v262_v6 = vld [vmem:[%s252_s4] sm:$0xff]  ;;  %v416_v56 = vunpack.c.0.s8 %v415_v54  ;;  %s451_s14 = sshll.u32 %s243_s13, 4  ;;  %s449_s17 = scalar_lea.hbm %s856_s5, %s547_s12  ;;  %s452_s14 = int_to_ptr.vmem [resolvable:$true] %s451_s14 }
  0x1b   : > { %v274_v7 = vcombine.high %v262_v6, %v262_v6  ;;  %s619_s19 = scalar_lea.vmem %s452_s14, 32  ;;  %s700_s4 = smov [#allocation3]  }
  0x1c   : > { %v419_v59 = vsub.s32 %v416_v56, %v418_v57  ;;  %p620_p12 = scmp.ne.s32.totalorder %s452_s14, %s619_s19  ;;  %s623_s26 = sshll.u32 %s700_s4, 4  ;;  %s624_s26 = int_to_ptr.vmem [resolvable:$false] %s623_s26 }
  0x1d   : > { %270 = vperm.xlu0 %608, %v258_v4   ;;  %375 = vperm.xlu1 %609, %v260_v5   ;;  %s625_s23 = scalar_lea.vmem %s624_s26, 64  ;;  %p626_p1 = scmp.lt.s32.totalorder %s452_s14, %s624_s26 }
  0x1e   : > { %535 = vmatprep.subr.msk.mxu0 %vm282_vm0, %v274_v7  ;;  %548 = vmatprep.subr.msk.mxu1 %vm282_vm0, %v274_v7  ;;  %p621_p13 = pnand %p620_p12, %p774_p4  ;;  %p627_p2 = scmp.lt.s32.totalorder %s625_s23, %s619_s19 }
  0x1f   : > { %536 = vmatpush1.msk.msra.mxu0 %vm282_vm0, %v262_v6  ;;  %549 = vmatpush1.msk.msra.mxu1 %vm282_vm0, %v262_v6 }
  0x20   : > { %537 = vmatmul.mubr.msk.f32.vlgmr.msra.gmra.mxu0 %vm275_vm1, %v255_v8  ;;  %538 = vmatmul.mubr.msk.f32.vlgmr.msra.gmra.mxu1 %vm275_vm1, %v256_v9  ;;  %p622_p0 = pneg %p621_p13  ;;  %p628_p3 = por %p627_p2, %p626_p1 }
  0x22   : > { %p629_p5 = pnand %p628_p3, %p622_p0 }
  0x94   : > { %v266_v10 = vpop.permute.xlu0 %265  ;;  %v371_v11 = vpop.permute.xlu1 %370 }
  0x98   : > { %v271_v12 = vpop.permute.xlu0 %270  ;;  %v376_v23 = vpop.permute.xlu1 %375 }
  0xe0   : > { %v353_v13 = vpop.f32.mrf.mxu0  ;;  %v359_v14 = vpop.f32.mrf.mxu1 }
  0xe1   : > { %v354_v15 = vadd.f32 %v353_v13, %v266_v10  ;;  %v360_v16 = vadd.f32 %v359_v14, %v271_v12 }
  0xe2   : > { %v355_v17 = vpop.f32.mrf.mxu0  ;;  %v361_v18 = vpop.f32.mrf.mxu1 }
  0xe3   : > { %v364_v19 = vmax.f32 %v354_v15, 0.0  ;;  %v366_v20 = vmax.f32 %v360_v16, 0.0  ;;  %v356_v21 = vadd.f32 %v355_v17, %v266_v10  ;;  %v362_v22 = vadd.f32 %v361_v18, %v271_v12 }
  0xe5   : > { %v378_v24 = vmul.f32 %v371_v11, %v364_v19  ;;  %v380_v25 = vmul.f32 %v376_v23, %v366_v20  ;;  %v365_v26 = vmax.f32 %v356_v21, 0.0  ;;  %v367_v27 = vmax.f32 %v362_v22, 0.0 }
  0xe7   : > { %v382_v28 = vadd.f32 %v380_v25, %v378_v24  ;;  %v379_v29 = vmul.f32 %v371_v11, %v365_v26  ;;  %v381_v30 = vmul.f32 %v376_v23, %v367_v27 }
  0xe9   : > { %v383_v31 = vrot.slane %v382_v28, 4  ;;  %v389_v32 = vadd.f32 %v381_v30, %v379_v29 }
  0xeb   : > { %v384_v33 = vadd.f32 %v383_v31, %v382_v28  ;;  %v390_v34 = vrot.slane %v389_v32, 4 }
  0xed   : > { %v385_v35 = vrot.slane %v384_v33, 2  ;;  %v391_v36 = vadd.f32 %v390_v34, %v389_v32 }
  0xef   : > { %v386_v37 = vadd.f32 %v385_v35, %v384_v33  ;;  %v392_v38 = vrot.slane %v391_v36, 2 }
  0xf1   : > { %v387_v39 = vrot.slane %v386_v37, 1  ;;  %v393_v40 = vadd.f32 %v392_v38, %v391_v36 }
  0xf3   : > { %v388_v42 = vadd.f32 %v387_v39, %v386_v37  ;;  %v394_v43 = vrot.slane %v393_v40, 1 }
  0xf5   : > { %v397_v44 = vadd.f32 %v396_v41, %v388_v42  ;;  %v395_v45 = vadd.f32 %v394_v43, %v393_v40 }
  0xf7   : > { %v539_v46 = vmul.f32 -1.442695, %v397_v44  ;;  %v398_v47 = vadd.f32 %v396_v41, %v395_v45 }
  0xf9   : > { %611 = vpow2.f32 %v539_v46  ;;  %v540_v48 = vmul.f32 -1.442695, %v398_v47 }
  0xfb   : > { %613 = vpow2.f32 %v540_v48 }
 0x106   : > { %v612_v49 = vpop.eup %611 }
 0x107   : > { %v405_v50 = vadd.f32 1.0, %v612_v49 }
 0x108   : > { %v614_v51 = vpop.eup %613 }
 0x109   : > { %v406_v52 = vadd.f32 1.0, %v614_v51  ;;  %615 = vrcp.f32 %v405_v50 }
 0x10b   : > { %617 = vrcp.f32 %v406_v52 }
 0x116   : > { %v616_v58 = vpop.eup %615 }
 0x118   : > { %v618_v60 = vpop.eup %617 }
 0x119   : > { %v413_v61 = vcombine.low %v616_v58, %v618_v60 }
 0x11b   : > { %v420_v62 = vrot.slane %v413_v61, %v419_v59 }
 0x11d   : > { %v427_v63 = vrot.slane %v420_v62, %v419_v59 }
 0x11f   : > { %433 = vst.msk [vmem:[%s243_s13] sm:$0x3] %vm431_vm2, %v427_v63 }
 0x120   : > { %632 = shalt.err (!%p629_p5)
}
 0x121   : > { %s633_s28 = scalar_lea.hbm %s449_s17, 32  ;;  %s637_s9 = scalar_lea.hbm %s856_s5, 64 }
 0x122   : > { %p634_p6 = scmp.ne.s32.totalorder %s449_s17, %s633_s28  ;;  %p638_p10 = scmp.lt.s32.totalorder %s449_s17, %s856_s5 }
 0x123   : > { %p639_p11 = scmp.lt.s32.totalorder %s637_s9, %s633_s28 }
 0x124   : > { %p635_p7 = pnand %p634_p6, %p774_p4 }
 0x125   : > { %p640_p12 = por %p639_p11, %p638_p10 }
 0x126   : > { %p636_p9 = pneg %p635_p7 }
 0x128   : > { %p641_p13 = pnand %p640_p12, %p636_p9 }
 0x12a   : > { %644 = shalt.err (!%p641_p13)
}
 0x12b   : > { %550 = dma.vmem_to_hbm [thread:$0]  (%p774_p4), %s452_s14, 32, %s449_s17, %s435_s18  }
 0x12c PF: > { %p556_p0 = scmp.ge.s32.totalorder %s695_s25, 2  ;;  %s463_s12 = sand.u32 1, %s675_s20  }
 0x12d   : > { %s464_s13 = scalar_lea.sflag [#allocation4], %s463_s12 }
 0x12e   : > { %p553_p1 = pnand %p556_p0, %p781_p8 }
 0x130   : > { %p554_p2 = pneg %p553_p1 }
 0x132   : > { %670 = dma.done.wait (%p554_p2), %s464_s13, 32  }
 0x133   : > { %672 = vsyncadd (%p554_p2), %s464_s13, 4294967264  ;;  %s19_s25 = sadd.s32 1, %s695_s25   ;;  %s859_s20 = smov %s679_s21 }
 0x134   : > { %p16_p3 = scmp.ge.s32.totalorder %s19_s25, 4   ;;  %s860_s21 = smov %s683_s22 }
 0x135   : > { %s861_s22 = smov %s787_s7  ;;  %s862_s23 = smov %s691_s24 }
 0x136   : > { %s863_s24 = smov %s865_s27  ;;  %18 = sbr.rel (!%p16_p3) target bundleno = 6 (0x6), region = 75 }
 0x13b   :  { %469 = vsyncpa [#allocation4], 1 }
 0x13c   :  { %471 = vsyncpa [#allocation4 + $0x1], 1 }

</bundles_post_ra>
